<compile_context>
chip_gen: v5e
topology: v5e:2x2
jax: 0.10.0
libtpu: 0.0.40
codegen_flags: <defaults>
</compile_context>

<pallas_src>
import jax
import jax.numpy as jnp
from jax.experimental import pallas as pl
from jax.experimental.pallas import tpu as pltpu

HIDDEN1 = 128      # fc1 width (already lane-dense)
HIDDEN2 = 64       # logical fc2 width
HIDDEN2_P = 128    # fc2 width zero-padded to a full lane
_LANE = 128
_SUBLANE = 8


def _round_up(x, m):
    return ((x + m - 1) // m) * m


def mlp_kernel(x_ref, w1_ref, b1_ref, w2_ref, b2_ref, w3_ref, b3_ref, o_ref):
    """One batch tile of fused fc1 -> ReLU -> (dropout=id) -> fc2 -> ReLU -> (dropout=id) -> fc3."""
    wdt = w1_ref.dtype
    x = x_ref[...]
    # fc1 + ReLU  (bf16 MXU multiply, f32 accumulate)
    h1 = jnp.dot(x.astype(wdt), w1_ref[...],
                 preferred_element_type=jnp.float32) + b1_ref[...]
    h1 = jnp.maximum(h1, 0.0)
    # TODO(synk): training-mode dropout (random mask + 1/(1-p) scaling) not implemented;
    #             inference-mode dropout is identity.
    # fc2 + ReLU  (padded hidden columns are relu(0) = 0)
    h2 = jnp.dot(h1.astype(wdt), w2_ref[...],
                 preferred_element_type=jnp.float32) + b2_ref[...]
    h2 = jnp.maximum(h2, 0.0)
    # fc3 (logits; padded output columns are all-zero)
    out = jnp.dot(h2.astype(wdt), w3_ref[...],
                  preferred_element_type=jnp.float32) + b3_ref[...]
    o_ref[...] = out.astype(o_ref.dtype)


def chatbot_forward(x, params, output_size, *, batch_tile=256):
    """Fused 3-layer MLP forward pass as a single batch-tiled Pallas TPU kernel.

    x      : (B, input_size) activations, f32 (or bf16 if the producer is bf16).
    params : dict from init_params() -- weights already lane-padded and bf16-cast
             once at init; no per-call weight pad/cast here.
    """
    w1, b1 = params["w1"], params["b1"]
    w2, b2 = params["w2"], params["b2"]
    w3, b3 = params["w3"], params["b3"]

    B, in_size = x.shape
    in_p = w1.shape[0]     # lane-padded input width
    out_p = w3.shape[1]    # lane-padded output width

    # Lane-pad x's feature dim to match the pre-padded w1 (extra columns are zero,
    # so they contribute nothing to the fc1 contraction).
    if in_p != in_size:
        x = jnp.pad(x, ((0, 0), (0, in_p - in_size)))

    # Batch tile: multiple of the f32 sublane (8); cap it so the grid has at least
    # 2 steps whenever B > 8 so both TensorCores get work on v7x.
    tb = min(_round_up(batch_tile, _SUBLANE), _round_up(B, _SUBLANE))
    if B > _SUBLANE:
        tb = min(tb, _round_up(pl.cdiv(B, 2), _SUBLANE))
    b_p = _round_up(B, tb)
    if b_p != B:
        x = jnp.pad(x, ((0, b_p - B), (0, 0)))

    grid = (b_p // tb,)

    weights = (w1, b1, w2, b2, w3, b3)
    weight_bytes = sum(int(a.size) * a.dtype.itemsize for a in weights)

    # Explicit VMEM budget: double-buffered x/out tiles + single-buffered resident
    # weights + headroom for h1/h2 intermediates and compiler scratch.
    act_bytes = 2 * tb * in_p * x.dtype.itemsize + 2 * tb * out_p * 4
    vmem_limit = int(1.5 * (act_bytes + weight_bytes)) + (2 << 20)
    vmem_limit = max(16 << 20, min(vmem_limit, 64 << 20))

    bytes_accessed = (b_p * in_p * x.dtype.itemsize
                      + weight_bytes
                      + b_p * out_p * 4)
    flops = 2 * b_p * (in_p * HIDDEN1 + HIDDEN1 * HIDDEN2_P + HIDDEN2_P * out_p)

    def _const(i):   # weights: same block every grid step -> stay resident in VMEM
        return (0, 0)

    def _wspec(shape):
        # Constant index_map: single-buffer resident weights (double-buffering
        # them would only waste VMEM, esp. on v7x's 64 MiB / v5e's 16 MiB budget).
        return pl.BlockSpec(shape, _const,
                            pipeline_mode=pl.Buffered(buffer_count=1))

    # TODO(synk): for vocab-sized w1 approaching ~1/4 of VMEM (notably v7x: 64 MiB
    #             physical, 32 MiB scoped default), add a K-reduction grid axis for
    #             fc1 (tile w1 along in_p, f32 VMEM accumulator, axis last, marked
    #             "arbitrary") instead of keeping w1 whole-array resident.
    out_padded = pl.pallas_call(
        mlp_kernel,
        out_shape=jax.ShapeDtypeStruct((b_p, out_p), jnp.float32),
        grid=grid,
        in_specs=[
            pl.BlockSpec((tb, in_p), lambda i: (i, 0)),
            _wspec(w1.shape), _wspec(b1.shape),
            _wspec(w2.shape), _wspec(b2.shape),
            _wspec(w3.shape), _wspec(b3.shape),
        ],
        out_specs=pl.BlockSpec((tb, out_p), lambda i: (i, 0)),
        compiler_params=pltpu.CompilerParams(
            dimension_semantics=("parallel",),
            vmem_limit_bytes=vmem_limit),
        cost_estimate=pl.CostEstimate(
            flops=flops, transcendentals=0, bytes_accessed=bytes_accessed),
    )(x, *weights)

    # TODO(synk): for large B, consume the padded (b_p, out_p) logits directly (or
    #             fuse this slice into the consumer) to avoid an extra HBM pass.
    return out_padded[:B, :output_size]


def init_params(key, input_size, output_size, *, weight_dtype=jnp.bfloat16):
    """Deterministic init mimicking PyTorch nn.Linear default (U(+/- 1/sqrt(fan_in))).

    All layout plumbing is done ONCE here (never per forward call):
      * weights stored as (in_features, out_features) so the kernel computes x @ W + b,
      * w1 rows zero-padded so fc1's K dim is a multiple of 128,
      * fc2/fc3 zero-padded so the 64-wide hidden becomes a full 128-lane dim,
      * w3 columns zero-padded to a multiple of 128 (lane-dense, unmasked output stores),
      * weights cast to bf16 (MXU fast path, half the HBM/VMEM traffic); biases stay f32
        since they are added after the f32 accumulation.
    """
    def linear(key, fan_in, fan_out, pad_in, pad_out):
        kw, kb = jax.random.split(key)
        bound = float(fan_in) ** -0.5
        w = jax.random.uniform(kw, (fan_in, fan_out), jnp.float32, -bound, bound)
        b = jax.random.uniform(kb, (1, fan_out), jnp.float32, -bound, bound)
        w = jnp.pad(w, ((0, pad_in - fan_in), (0, pad_out - fan_out)))
        b = jnp.pad(b, ((0, 0), (0, pad_out - fan_out)))
        return w.astype(weight_dtype), b

    in_p = _round_up(input_size, _LANE)
    out_p = _round_up(output_size, _LANE)

    k1, k2, k3 = jax.random.split(key, 3)
    w1, b1 = linear(k1, input_size, HIDDEN1, in_p, HIDDEN1)
    w2, b2 = linear(k2, HIDDEN1, HIDDEN2, HIDDEN1, HIDDEN2_P)
    w3, b3 = linear(k3, HIDDEN2, output_size, HIDDEN2_P, out_p)
    return dict(w1=w1, b1=b1, w2=w2, b2=b2, w3=w3, b3=b3)


def _ref_forward(x, params, output_size):
    """Plain-JAX reference with the identical padded bf16-operand / f32-accumulate math."""
    wdt = params["w1"].dtype
    in_p = params["w1"].shape[0]
    xp = jnp.pad(x, ((0, 0), (0, in_p - x.shape[1])))
    h = jnp.dot(xp.astype(wdt), params["w1"],
                preferred_element_type=jnp.float32) + params["b1"]
    h = jnp.maximum(h, 0.0)
    h = jnp.dot(h.astype(wdt), params["w2"],
                preferred_element_type=jnp.float32) + params["b2"]
    h = jnp.maximum(h, 0.0)
    out = jnp.dot(h.astype(wdt), params["w3"],
                  preferred_element_type=jnp.float32) + params["b3"]
    return out[:, :output_size]


if __name__ == "__main__":
    key = jax.random.PRNGKey(0)
    k_params, k_x = jax.random.split(key)

    batch = 8
    input_size = 32   # e.g. bag-of-words vocabulary size
    output_size = 16  # e.g. number of intent classes

    params = init_params(k_params, input_size, output_size)
    x = jax.random.uniform(k_x, (batch, input_size), jnp.float32)

    out = chatbot_forward(x, params, output_size)
    jax.block_until_ready(out)

    ref = _ref_forward(x, params, output_size)
    assert out.shape == (batch, output_size), out.shape
    assert jnp.allclose(out, ref, atol=1e-2, rtol=1e-2), (
        float(jnp.max(jnp.abs(out - ref))))

    print("KERNEL_OK")
</pallas_src>

<mosaic_0001>
module attributes {stable_mosaic.version = 11 : i64} {
  func.func @mlp_kernel(%arg0: i32, %arg1: memref<8x128xf32, #tpu.memory_space<vmem>>, %arg2: memref<128x128xbf16, #tpu.memory_space<vmem>>, %arg3: memref<1x128xf32, #tpu.memory_space<vmem>>, %arg4: memref<128x128xbf16, #tpu.memory_space<vmem>>, %arg5: memref<1x128xf32, #tpu.memory_space<vmem>>, %arg6: memref<128x128xbf16, #tpu.memory_space<vmem>>, %arg7: memref<1x128xf32, #tpu.memory_space<vmem>>, %arg8: memref<8x128xf32, #tpu.memory_space<vmem>>) attributes {dimension_semantics = [#tpu.dimension_semantics<parallel>], iteration_bounds = array<i64: 1>, scalar_prefetch = 0 : i64, scratch_operands = 0 : i64, tpu.core_type = #tpu.core_type<tc>, window_params = [{transform_indices = @transform_0, window_bounds = array<i64: 8, 128>}, {pipeline_mode = #tpu.pipeline_mode<synchronous>, transform_indices = @transform_1, window_bounds = array<i64: 128, 128>}, {pipeline_mode = #tpu.pipeline_mode<synchronous>, transform_indices = @transform_2, window_bounds = array<i64: 1, 128>}, {pipeline_mode = #tpu.pipeline_mode<synchronous>, transform_indices = @transform_3, window_bounds = array<i64: 128, 128>}, {pipeline_mode = #tpu.pipeline_mode<synchronous>, transform_indices = @transform_4, window_bounds = array<i64: 1, 128>}, {pipeline_mode = #tpu.pipeline_mode<synchronous>, transform_indices = @transform_5, window_bounds = array<i64: 128, 128>}, {pipeline_mode = #tpu.pipeline_mode<synchronous>, transform_indices = @transform_6, window_bounds = array<i64: 1, 128>}, {transform_indices = @transform_7, window_bounds = array<i64: 8, 128>}]} {
    %c0 = arith.constant 0 : index
    %c0_0 = arith.constant 0 : index
    %0 = vector.load %arg1[%c0, %c0_0] : memref<8x128xf32, #tpu.memory_space<vmem>>, vector<8x128xf32>
    %1 = arith.truncf %0 : vector<8x128xf32> to vector<8x128xbf16>
    %c0_1 = arith.constant 0 : index
    %c0_2 = arith.constant 0 : index
    %2 = vector.load %arg2[%c0_1, %c0_2] : memref<128x128xbf16, #tpu.memory_space<vmem>>, vector<128x128xbf16>
    %cst = arith.constant dense<0.000000e+00> : vector<8x128xf32>
    %3 = tpu.matmul %1, %2, %cst {dimension_numbers = #tpu.dot_dimension_numbers<[1], [0], [0], [1], [0, 0, 1, 1], [], []>} : vector<8x128xbf16>, vector<128x128xbf16>, vector<8x128xf32> -> vector<8x128xf32>
    %c0_3 = arith.constant 0 : index
    %c0_4 = arith.constant 0 : index
    %4 = vector.load %arg3[%c0_3, %c0_4] : memref<1x128xf32, #tpu.memory_space<vmem>>, vector<1x128xf32>
    %5 = vector.broadcast %4 : vector<1x128xf32> to vector<8x128xf32>
    %6 = arith.addf %3, %5 : vector<8x128xf32>
    %cst_5 = arith.constant 0.000000e+00 : f32
    %7 = vector.broadcast %cst_5 : f32 to vector<8x128xf32>
    %8 = arith.maximumf %6, %7 : vector<8x128xf32>
    %9 = arith.truncf %8 : vector<8x128xf32> to vector<8x128xbf16>
    %c0_6 = arith.constant 0 : index
    %c0_7 = arith.constant 0 : index
    %10 = vector.load %arg4[%c0_6, %c0_7] : memref<128x128xbf16, #tpu.memory_space<vmem>>, vector<128x128xbf16>
    %cst_8 = arith.constant dense<0.000000e+00> : vector<8x128xf32>
    %11 = tpu.matmul %9, %10, %cst_8 {dimension_numbers = #tpu.dot_dimension_numbers<[1], [0], [0], [1], [0, 0, 1, 1], [], []>} : vector<8x128xbf16>, vector<128x128xbf16>, vector<8x128xf32> -> vector<8x128xf32>
    %c0_9 = arith.constant 0 : index
    %c0_10 = arith.constant 0 : index
    %12 = vector.load %arg5[%c0_9, %c0_10] : memref<1x128xf32, #tpu.memory_space<vmem>>, vector<1x128xf32>
    %13 = vector.broadcast %12 : vector<1x128xf32> to vector<8x128xf32>
    %14 = arith.addf %11, %13 : vector<8x128xf32>
    %cst_11 = arith.constant 0.000000e+00 : f32
    %15 = vector.broadcast %cst_11 : f32 to vector<8x128xf32>
    %16 = arith.maximumf %14, %15 : vector<8x128xf32>
    %17 = arith.truncf %16 : vector<8x128xf32> to vector<8x128xbf16>
    %c0_12 = arith.constant 0 : index
    %c0_13 = arith.constant 0 : index
    %18 = vector.load %arg6[%c0_12, %c0_13] : memref<128x128xbf16, #tpu.memory_space<vmem>>, vector<128x128xbf16>
    %cst_14 = arith.constant dense<0.000000e+00> : vector<8x128xf32>
    %19 = tpu.matmul %17, %18, %cst_14 {dimension_numbers = #tpu.dot_dimension_numbers<[1], [0], [0], [1], [0, 0, 1, 1], [], []>} : vector<8x128xbf16>, vector<128x128xbf16>, vector<8x128xf32> -> vector<8x128xf32>
    %c0_15 = arith.constant 0 : index
    %c0_16 = arith.constant 0 : index
    %20 = vector.load %arg7[%c0_15, %c0_16] : memref<1x128xf32, #tpu.memory_space<vmem>>, vector<1x128xf32>
    %21 = vector.broadcast %20 : vector<1x128xf32> to vector<8x128xf32>
    %22 = arith.addf %19, %21 : vector<8x128xf32>
    %c0_17 = arith.constant 0 : index
    %c0_18 = arith.constant 0 : index
    %23 = vector.load %arg8[%c0_17, %c0_18] : memref<8x128xf32, #tpu.memory_space<vmem>>, vector<8x128xf32>
    tpu.vector_store %arg8[%c0_17, %c0_18], %22 {strides = array<i32>} : memref<8x128xf32, #tpu.memory_space<vmem>>, vector<8x128xf32>,
    return
  }
  func.func @transform_0(%arg0: i32) -> (i32, i32) {
    %c0_i32 = arith.constant 0 : i32
    %c0_i32_0 = arith.constant 0 : i32
    return %arg0, %c0_i32 : i32, i32
  }
  func.func @transform_1(%arg0: i32) -> (i32, i32) {
    %c0_i32 = arith.constant 0 : i32
    %c0_i32_0 = arith.constant 0 : i32
    %c0_i32_1 = arith.constant 0 : i32
    return %c0_i32, %c0_i32_0 : i32, i32
  }
  func.func @transform_2(%arg0: i32) -> (i32, i32) {
    %c0_i32 = arith.constant 0 : i32
    %c0_i32_0 = arith.constant 0 : i32
    %c0_i32_1 = arith.constant 0 : i32
    return %c0_i32, %c0_i32_0 : i32, i32
  }
  func.func @transform_3(%arg0: i32) -> (i32, i32) {
    %c0_i32 = arith.constant 0 : i32
    %c0_i32_0 = arith.constant 0 : i32
    %c0_i32_1 = arith.constant 0 : i32
    return %c0_i32, %c0_i32_0 : i32, i32
  }
  func.func @transform_4(%arg0: i32) -> (i32, i32) {
    %c0_i32 = arith.constant 0 : i32
    %c0_i32_0 = arith.constant 0 : i32
    %c0_i32_1 = arith.constant 0 : i32
    return %c0_i32, %c0_i32_0 : i32, i32
  }
  func.func @transform_5(%arg0: i32) -> (i32, i32) {
    %c0_i32 = arith.constant 0 : i32
    %c0_i32_0 = arith.constant 0 : i32
    %c0_i32_1 = arith.constant 0 : i32
    return %c0_i32, %c0_i32_0 : i32, i32
  }
  func.func @transform_6(%arg0: i32) -> (i32, i32) {
    %c0_i32 = arith.constant 0 : i32
    %c0_i32_0 = arith.constant 0 : i32
    %c0_i32_1 = arith.constant 0 : i32
    return %c0_i32, %c0_i32_0 : i32, i32
  }
  func.func @transform_7(%arg0: i32) -> (i32, i32) {
    %c0_i32 = arith.constant 0 : i32
    %c0_i32_0 = arith.constant 0 : i32
    return %arg0, %c0_i32 : i32, i32
  }
}

</mosaic_0001>

<bundles_post_ra>
// kernel: tpu_custom_call.1
= control target key start
LH: loop header
LB: loop body
LE: loop exit
PB: predicated region body
PF: predicated region fallthrough
CT: control target
= control target key end

     0   :  { %12 = vsyncpa [#allocation3], 0  ;;  %s686_s0 = inlined_call_operand.hbm [shape: f32[8,128], index: 0, kind: input, shape index: {}]   ;;  %s687_s1 = inlined_call_operand.hbm [shape: bf16[128,128], index: 1, kind: input, shape index: {}]   ;;  %s688_s2 = inlined_call_operand.vmem [shape: f32[1,128], index: 2, kind: input, shape index: {}]   ;;  %s689_s3 = inlined_call_operand.hbm [shape: bf16[128,128], index: 3, kind: input, shape index: {}]   ;;  %s690_s4 = inlined_call_operand.vmem [shape: f32[1,128], index: 4, kind: input, shape index: {}]   ;;  %s691_s5 = inlined_call_operand.hbm [shape: bf16[128,128], index: 5, kind: input, shape index: {}]   ;;  %s692_s6 = inlined_call_operand.vmem [shape: f32[1,128], index: 6, kind: input, shape index: {}]   ;;  %s693_s7 = inlined_call_operand.hbm [shape: f32[8,128], index: 7, kind: output, shape index: {}]  }
   0x1   :  { %13 = vsyncpa [#allocation6], 0 }
   0x2   :  { %14 = vsyncpa [#allocation9], 0  ;;  %s31_s26 = sshll.u32 %s687_s1, 4  ;;  %s32_s26 = int_to_ptr.hbm [resolvable:$true] %s31_s26 }
   0x3   :  { %15 = vsyncpa [#allocation4], 0  ;;  %s615_s27 = smov [#allocation5]   ;;  %s21_s8 = sshll.u32 %s686_s0, 4  ;;  %s22_s8 = int_to_ptr.hbm [resolvable:$true] %s21_s8 }
   0x4   :  { %s33_s28 = sshll.u32 %s615_s27, 4  ;;  %s616_s9 = smov 64   ;;  %s34_s28 = int_to_ptr.vmem [resolvable:$true] %s33_s28 }
   0x5   :  { %s617_s10 = smov 4   ;;  %s618_s11 = smov [#allocation2]  }
   0x6   :  { %39 = dma.hbm_to_vmem [thread:$0]  %s32_s26, 1024, %s34_s28, [#allocation6], %s616_s9, %s616_s9, %s617_s10  }
   0x7   :  { %s23_s12 = sshll.u32 %s618_s11, 4  ;;  %s46_s15 = sshll.u32 %s689_s3, 4  ;;  %s24_s12 = int_to_ptr.vmem [resolvable:$true] %s23_s12  ;;  %s47_s15 = int_to_ptr.hbm [resolvable:$true] %s46_s15 }
   0x8   :  { %26 = dma.hbm_to_vmem [thread:$0]  %s22_s8, 128, %s24_s12, [#allocation3]  }
   0x9   :  { %s61_s17 = sshll.u32 %s691_s5, 4  ;;  %s619_s18 = smov [#allocation7]   ;;  %s62_s17 = int_to_ptr.hbm [resolvable:$true] %s61_s17 }
   0xa   :  { %s48_s19 = sshll.u32 %s619_s18, 4  ;;  %s620_s0 = smov [#allocation8]   ;;  %s49_s19 = int_to_ptr.vmem [resolvable:$true] %s48_s19 }
   0xb   :  { %54 = dma.hbm_to_vmem [thread:$0]  %s47_s15, 1024, %s49_s19, [#allocation6], %s616_s9, %s616_s9, %s617_s10  }
   0xc   :  { %s63_s20 = sshll.u32 %s620_s0, 4  ;;  %s64_s20 = int_to_ptr.vmem [resolvable:$true] %s63_s20 }
   0xd   :  { %69 = dma.hbm_to_vmem [thread:$0]  %s62_s17, 1024, %s64_s20, [#allocation9], %s616_s9, %s616_s9, %s617_s10  }
   0xe   :  { %607 = dma.done.wait [#allocation3], 128  }
   0xf   :  { %608 = vsyncadd [#allocation3], 4294967168 }
  0x10   :  { %609 = dma.done.wait [#allocation6], 2048  }
  0x11   :  { %610 = vsyncadd [#allocation6], 4294965248 }
  0x12   :  { %611 = dma.done.wait [#allocation9], 1024  }
  0x13   :  { %612 = vsyncadd [#allocation9], 4294966272  ;;  %v460_v0 = vld [vmem:[#allocation5 + $0x38] sm:$0xff]  ;;  %v459_v1 = vld [vmem:[#allocation5 + $0x30] sm:$0xff]  ;;  %s621_s24 = smov [#allocation10]   ;;  %s345_s28 = sshll.u32 %s693_s7, 4  ;;  %s346_s28 = int_to_ptr.hbm [resolvable:$true] %s345_s28 }
  0x14   :  { %158 = vmatpush.bf16.msra.mxu0 %v460_v0  ;;  %v468_v2 = vld [vmem:[#allocation7 + $0x38] sm:$0xff]  ;;  %v467_v3 = vld [vmem:[#allocation7 + $0x30] sm:$0xff]  ;;  %v458_v4 = vld [vmem:[#allocation5 + $0x28] sm:$0xff]  ;;  %s343_s25 = sshll.u32 %s621_s24, 4  ;;  %s344_s25 = int_to_ptr.vmem [resolvable:$true] %s343_s25 }
  0x15   :  { %241 = vmatpush.bf16.msra.mxu1 %v468_v2  ;;  %v466_v5 = vld [vmem:[#allocation7 + $0x28] sm:$0xff]  ;;  %v457_v6 = vld [vmem:[#allocation5 + $0x20] sm:$0xff]  ;;  %v456_v8 = vld [vmem:[#allocation5 + $0x18] sm:$0xff] }
  0x16   :  { %v465_v7 = vld [vmem:[#allocation7 + $0x20] sm:$0xff]  ;;  %v464_v9 = vld [vmem:[#allocation7 + $0x18] sm:$0xff]  ;;  %v455_v10 = vld [vmem:[#allocation5 + $0x10] sm:$0xff] }
  0x17   :  { %v463_v11 = vld [vmem:[#allocation7 + $0x10] sm:$0xff]  ;;  %v454_v12 = vld [vmem:[#allocation5 + $0x8] sm:$0xff]  ;;  %v453_v13 = vld [vmem:[#allocation5] sm:$0xff] }
  0x18   :  { %159 = vmatpush.bf16.msra.mxu0 %v459_v1  ;;  %v88_v14 = vld [vmem:[#allocation2] sm:$0xff]  ;;  %v462_v16 = vld [vmem:[#allocation7 + $0x8] sm:$0xff]  ;;  %v461_v17 = vld [vmem:[#allocation7] sm:$0xff] }
  0x19   :  { %242 = vmatpush.bf16.msra.mxu1 %v467_v3  ;;  %v89_v15 = vpack.c.bf16 %v88_v14, %v88_v14  ;;  %v476_v18 = vld [vmem:[#allocation8 + $0x38] sm:$0xff]  ;;  %v475_v19 = vld [vmem:[#allocation8 + $0x30] sm:$0xff]  ;;  %v474_v20 = vld [vmem:[#allocation8 + $0x28] sm:$0xff] }
  0x1a   :  { %324 = vmatpush.bf16.msra.mxu2 %v476_v18  ;;  %v473_v21 = vld [vmem:[#allocation8 + $0x20] sm:$0xff]  ;;  %v472_v22 = vld [vmem:[#allocation8 + $0x18] sm:$0xff]  ;;  %v471_v23 = vld [vmem:[#allocation8 + $0x10] sm:$0xff] }
  0x1b   :  { %v484_v24 = vld [vmem:[%s688_s2] ss:$0 sm:$0xff]  ;;  %v470_v30 = vld [vmem:[#allocation8 + $0x8] sm:$0xff]  ;;  %v469_v31 = vld [vmem:[#allocation8] sm:$0xff] }
  0x1c   :  { %160 = vmatpush.bf16.msra.mxu0 %v458_v4  ;;  %v485_v32 = vld [vmem:[%s690_s4] ss:$0 sm:$0xff] }
  0x1d   :  { %243 = vmatpush.bf16.msra.mxu1 %v466_v5  ;;  %v486_v38 = vld [vmem:[%s692_s6] ss:$0 sm:$0xff] }
  0x1e   :  { %325 = vmatpush.bf16.msra.mxu2 %v475_v19 }
  0x20   :  { %161 = vmatpush.bf16.msra.mxu0 %v457_v6 }
  0x21   :  { %244 = vmatpush.bf16.msra.mxu1 %v465_v7 }
  0x22   :  { %326 = vmatpush.bf16.msra.mxu2 %v474_v20 }
  0x24   :  { %162 = vmatpush.bf16.msra.mxu0 %v456_v8 }
  0x25   :  { %245 = vmatpush.bf16.msra.mxu1 %v464_v9 }
  0x26   :  { %327 = vmatpush.bf16.msra.mxu2 %v473_v21 }
  0x28   :  { %163 = vmatpush.bf16.msra.mxu0 %v455_v10 }
  0x29   :  { %246 = vmatpush.bf16.msra.mxu1 %v463_v11 }
  0x2a   :  { %328 = vmatpush.bf16.msra.mxu2 %v472_v22 }
  0x2c   :  { %164 = vmatpush.bf16.msra.mxu0 %v454_v12 }
  0x2d   :  { %247 = vmatpush.bf16.msra.mxu1 %v462_v16 }
  0x2e   :  { %329 = vmatpush.bf16.msra.mxu2 %v471_v23 }
  0x30   :  { %165 = vmatpush.bf16.msra.mxu0 %v453_v13 }
  0x31   :  { %248 = vmatpush.bf16.msra.mxu1 %v461_v17 }
  0x32   :  { %330 = vmatpush.bf16.msra.mxu2 %v470_v30 }
  0x33   :  { %166 = vmatmul.bf16.vlgmr.msra.gmra.mxu0 %v89_v15 }
  0x36   :  { %331 = vmatpush.bf16.msra.mxu2 %v469_v31 }
  0xb0   :  { %v167_v25 = vpop.f32.mrf.mxu0 }
  0xb1   :  { %v168_v26 = vadd.f32 %v484_v24, %v167_v25 }
  0xb3   :  { %v171_v27 = vmax.f32 %v168_v26, 0.0 }
  0xb5   :  { %v172_v28 = vpack.c.bf16 %v171_v27, %v171_v27 }
  0xb7   :  { %249 = vmatmul.bf16.vlgmr.msra.gmra.mxu1 %v172_v28 }
  0xb8   :  { %v169_v29 = vpop.f32.mrf.mxu0 }
 0x134   :  { %v250_v33 = vpop.f32.mrf.mxu1 }
 0x135   :  { %v251_v34 = vadd.f32 %v485_v32, %v250_v33 }
 0x137   :  { %v254_v35 = vmax.f32 %v251_v34, 0.0 }
 0x139   :  { %v255_v36 = vpack.c.bf16 %v254_v35, %v254_v35 }
 0x13b   :  { %332 = vmatmul.bf16.vlgmr.msra.gmra.mxu2 %v255_v36 }
 0x13c   :  { %v252_v37 = vpop.f32.mrf.mxu1 }
 0x1be   :  { %v333_v39 = vpop.f32.mrf.mxu2 }
 0x1bf   :  { %v334_v40 = vadd.f32 %v486_v38, %v333_v39 }
 0x1c1   :  { %337 = vst [vmem:[#allocation10] sm:$0xff] %v334_v40 }
 0x1c2   :  { %348 = dma.vmem_to_hbm [thread:$0]  %s344_s25, 128, %s346_s28, [#allocation4]  }
 0x1c6   :  { %v335_v41 = vpop.f32.mrf.mxu2 }
 0x1c7   :  { %613 = dma.done.wait [#allocation4], 128  }
 0x1c8   :  { %614 = vsyncadd [#allocation4], 4294967168 }
 0x1c9   :  { %353 = vsyncpa [#allocation3], 1 }
 0x1ca   :  { %354 = vsyncpa [#allocation6], 1 }
 0x1cb   :  { %355 = vsyncpa [#allocation9], 1 }
 0x1cc   :  { %356 = vsyncpa [#allocation4], 1 }

</bundles_post_ra>
